<compile_context>
chip_gen: v7x
topology: tpu7x:2x2x1
jax: 0.10.0
libtpu: 0.0.40
codegen_flags: <defaults>
</compile_context>

<pallas_src>
import functools

import jax
import jax.numpy as jnp
from jax.experimental import pallas as pl
from jax.experimental.pallas import tpu as pltpu


def _round_up(x, m):
    return ((x + m - 1) // m) * m


def _vae_kernel(x_ref,
                w1_ref, b1_ref,
                wmv_ref, bmv_ref,
                w2_ref, b2_ref,
                w3_ref, b3_ref,
                out_ref, mu_ref, logvar_ref,
                *, middle):
    """One row tile (TM rows) of the VAE forward, natural (rows, features) layout."""
    x = x_ref[...]                                                  # (TM, D)

    # encode: h1 = relu(x @ W1 + b1)                                 -> (TM, F)
    h1 = jnp.dot(x, w1_ref[...], preferred_element_type=jnp.float32) + b1_ref[...]
    h1 = jnp.maximum(h1, 0.0)

    # fused heads: [mu | logvar] = h1 @ Wmv + bmv                    -> (TM, 2M)
    mv = jnp.dot(h1, wmv_ref[...], preferred_element_type=jnp.float32) + bmv_ref[...]
    mu = mv[:, :middle]
    mu_ref[...] = mu.astype(mu_ref.dtype)
    logvar_ref[...] = mv[:, middle:].astype(logvar_ref.dtype)

    # reparametrize (eval mode): z = mu                              -> (TM, M)
    z = mu

    # decode: sigmoid(relu(z @ W2 + b2) @ W3 + b3)                   -> (TM, D)
    h2 = jnp.dot(z, w2_ref[...], preferred_element_type=jnp.float32) + b2_ref[...]
    h2 = jnp.maximum(h2, 0.0)
    logits = jnp.dot(h2, w3_ref[...], preferred_element_type=jnp.float32) + b3_ref[...]
    # sigmoid(x) == 0.5*tanh(0.5*x) + 0.5 : a single EUP op per element.
    out_ref[...] = (0.5 * jnp.tanh(0.5 * logits) + 0.5).astype(out_ref.dtype)


_VMEM_BUDGET = 36 * 1024 * 1024      # conservative: v7x has only 64 MiB physical VMEM
_VMEM_LIMIT_CAP = 56 * 1024 * 1024   # stays below v7x physical; well below v5e/v6e


def vae_forward(x, params, *, row_tile=8192):
    """x: (B, T, D) float32.  Returns (out, mu, logvar) matching the torch module."""
    B, T, D = x.shape
    N = B * T

    w1, b1 = params["w1"], params["b1"]          # (D, F), (1, F)
    wmu, bmu = params["wmu"], params["bmu"]      # (F, M), (1, M)
    wvar, bvar = params["wvar"], params["bvar"]  # (F, M), (1, M)
    w2, b2 = params["w2"], params["b2"]          # (M, S), (1, S)
    w3, b3 = params["w3"], params["b3"]          # (S, D), (1, D)

    F_ = w1.shape[1]
    M = wmu.shape[1]
    S = w2.shape[1]

    # Fused mu/logvar head (one-off concat of two tiny weights).
    wmv = jnp.concatenate([wmu, wvar], axis=1)   # (F, 2M)
    bmv = jnp.concatenate([bmu, bvar], axis=1)   # (1, 2M)

    x2 = x.reshape(N, D)                         # free row-major reshape, no copy

    # ---- row-tile selection: VMEM budget + per-step-overhead amortization ----
    weights = (w1, b1, wmv, bmv, w2, b2, w3, b3)
    weight_bytes = 4 * sum(int(a.size) for a in weights)
    stream_row = 4 * (2 * D + 2 * M)             # per row: x in + recon out + mu/logvar out
    live_row = 4 * (F_ + 2 * M + S + D)          # h1, mv, h2, logits intermediates
    per_row = 2 * stream_row + live_row          # streamed blocks are double-buffered
    avail = max(_VMEM_BUDGET - 2 * weight_bytes, 4 * 1024 * 1024)
    tm_cap = max(128, (avail // per_row) // 128 * 128)
    tm_desired = max(128, (min(row_tile, tm_cap) // 128) * 128)

    if N <= 128:
        tm = N                                   # a single full block (always legal)
    elif N <= 2 * tm_desired:
        # v7x has 2 TensorCores: make sure the "parallel" grid has >= 2 steps.
        tm = _round_up(pl.cdiv(N, 2), 128)
    else:
        tm = tm_desired
    grid = (pl.cdiv(N, tm),)

    est_vmem = 2 * weight_bytes + tm * per_row + (2 << 20)
    vmem_limit = int(min(max(est_vmem, 32 * 1024 * 1024), _VMEM_LIMIT_CAP))

    row_spec = lambda d: pl.BlockSpec((tm, d), lambda i: (i, 0))
    full = lambda a: pl.BlockSpec(a.shape, lambda i: (0, 0))   # VMEM-resident weights

    cost = pl.CostEstimate(
        flops=2 * N * (D * F_ + F_ * 2 * M + M * S + S * D),
        transcendentals=N * D,                   # one tanh per output element
        bytes_accessed=4 * (2 * N * D + 2 * N * M) + weight_bytes,
    )

    out2, mu2, logvar2 = pl.pallas_call(
        functools.partial(_vae_kernel, middle=M),
        out_shape=(
            jax.ShapeDtypeStruct((N, D), x.dtype),      # reconstruction
            jax.ShapeDtypeStruct((N, M), jnp.float32),  # mu
            jax.ShapeDtypeStruct((N, M), jnp.float32),  # logvar
        ),
        grid=grid,
        in_specs=[
            row_spec(D),
            full(w1), full(b1),
            full(wmv), full(bmv),
            full(w2), full(b2),
            full(w3), full(b3),
        ],
        out_specs=(row_spec(D), row_spec(M), row_spec(M)),
        compiler_params=pltpu.CompilerParams(
            dimension_semantics=("parallel",),
            vmem_limit_bytes=vmem_limit,
        ),
        cost_estimate=cost,
    )(x2, w1, b1, wmv, bmv, w2, b2, w3, b3)

    return (out2.reshape(B, T, D),
            mu2.reshape(B, T, M),
            logvar2.reshape(B, T, M))


def init_params(key, input_dim, layer_dim):
    """Deterministic parameter init (Linear weights stored as (in, out))."""
    ks = jax.random.split(key, 10)

    def linear(kw, kb, fan_in, fan_out):
        bound = 1.0 / jnp.sqrt(fan_in)
        w = jax.random.uniform(kw, (fan_in, fan_out), jnp.float32, -bound, bound)
        b = jax.random.uniform(kb, (1, fan_out), jnp.float32, -bound, bound)
        return w, b

    F_, M, S = layer_dim["first"], layer_dim["middle"], layer_dim["second"]
    w1, b1 = linear(ks[0], ks[1], input_dim, F_)
    wmu, bmu = linear(ks[2], ks[3], F_, M)
    wvar, bvar = linear(ks[4], ks[5], F_, M)
    w2, b2 = linear(ks[6], ks[7], M, S)
    w3, b3 = linear(ks[8], ks[9], S, input_dim)
    return dict(w1=w1, b1=b1, wmu=wmu, bmu=bmu, wvar=wvar, bvar=bvar,
                w2=w2, b2=b2, w3=w3, b3=b3)


def vae_forward_ref(x, params):
    """Pure-JAX reference (same math, no Pallas) for a sanity check."""
    h1 = jnp.maximum(x @ params["w1"] + params["b1"], 0.0)
    mu = h1 @ params["wmu"] + params["bmu"]
    logvar = h1 @ params["wvar"] + params["bvar"]
    h2 = jnp.maximum(mu @ params["w2"] + params["b2"], 0.0)
    out = jax.nn.sigmoid(h2 @ params["w3"] + params["b3"])
    return out, mu, logvar


if __name__ == "__main__":
    key = jax.random.PRNGKey(0)
    k_x, k_p = jax.random.split(key)

    # Small shapes consistent with the module: x is (batch, maxlen, input_dim).
    B, T, D = 2, 8, 16
    layer_dim = {"first": 32, "middle": 8, "second": 32}

    x = jax.random.normal(k_x, (B, T, D), dtype=jnp.float32)
    params = init_params(k_p, D, layer_dim)

    out, mu, logvar = vae_forward(x, params)
    jax.block_until_ready((out, mu, logvar))

    # Cross-check against the pure-JAX reference (eval-mode semantics: z = mu).
    out_r, mu_r, lv_r = vae_forward_ref(x, params)
    assert out.shape == (B, T, D) and mu.shape == (B, T, layer_dim["middle"])
    assert logvar.shape == (B, T, layer_dim["middle"])
    assert jnp.allclose(out, out_r, atol=1e-5)
    assert jnp.allclose(mu, mu_r, atol=1e-5)
    assert jnp.allclose(logvar, lv_r, atol=1e-5)

    print("KERNEL_OK")
</pallas_src>

<mosaic_0001>
module attributes {stable_mosaic.version = 11 : i64} {
  func.func @_vae_kernel(%arg0: i32, %arg1: memref<16x16xf32, #tpu.memory_space<vmem>>, %arg2: memref<16x32xf32, #tpu.memory_space<vmem>>, %arg3: memref<1x32xf32, #tpu.memory_space<vmem>>, %arg4: memref<32x16xf32, #tpu.memory_space<vmem>>, %arg5: memref<1x16xf32, #tpu.memory_space<vmem>>, %arg6: memref<8x32xf32, #tpu.memory_space<vmem>>, %arg7: memref<1x32xf32, #tpu.memory_space<vmem>>, %arg8: memref<32x16xf32, #tpu.memory_space<vmem>>, %arg9: memref<1x16xf32, #tpu.memory_space<vmem>>, %arg10: memref<16x16xf32, #tpu.memory_space<vmem>>, %arg11: memref<16x8xf32, #tpu.memory_space<vmem>>, %arg12: memref<16x8xf32, #tpu.memory_space<vmem>>) attributes {dimension_semantics = [#tpu.dimension_semantics<parallel>], iteration_bounds = array<i64: 1>, scalar_prefetch = 0 : i64, scratch_operands = 0 : i64, tpu.core_type = #tpu.core_type<tc>, window_params = [{transform_indices = @transform_0, window_bounds = array<i64: 16, 16>}, {pipeline_mode = #tpu.pipeline_mode<synchronous>, transform_indices = @transform_1, window_bounds = array<i64: 16, 32>}, {pipeline_mode = #tpu.pipeline_mode<synchronous>, transform_indices = @transform_2, window_bounds = array<i64: 1, 32>}, {pipeline_mode = #tpu.pipeline_mode<synchronous>, transform_indices = @transform_3, window_bounds = array<i64: 32, 16>}, {pipeline_mode = #tpu.pipeline_mode<synchronous>, transform_indices = @transform_4, window_bounds = array<i64: 1, 16>}, {pipeline_mode = #tpu.pipeline_mode<synchronous>, transform_indices = @transform_5, window_bounds = array<i64: 8, 32>}, {pipeline_mode = #tpu.pipeline_mode<synchronous>, transform_indices = @transform_6, window_bounds = array<i64: 1, 32>}, {pipeline_mode = #tpu.pipeline_mode<synchronous>, transform_indices = @transform_7, window_bounds = array<i64: 32, 16>}, {pipeline_mode = #tpu.pipeline_mode<synchronous>, transform_indices = @transform_8, window_bounds = array<i64: 1, 16>}, {transform_indices = @transform_9, window_bounds = array<i64: 16, 16>}, {transform_indices = @transform_10, window_bounds = array<i64: 16, 8>}, {transform_indices = @transform_11, window_bounds = array<i64: 16, 8>}]} {
    %c0 = arith.constant 0 : index
    %c0_0 = arith.constant 0 : index
    %0 = vector.load %arg1[%c0, %c0_0] : memref<16x16xf32, #tpu.memory_space<vmem>>, vector<16x16xf32>
    %c0_1 = arith.constant 0 : index
    %c0_2 = arith.constant 0 : index
    %1 = vector.load %arg2[%c0_1, %c0_2] : memref<16x32xf32, #tpu.memory_space<vmem>>, vector<16x32xf32>
    %cst = arith.constant dense<0.000000e+00> : vector<16x32xf32>
    %2 = tpu.matmul %0, %1, %cst {dimension_numbers = #tpu.dot_dimension_numbers<[1], [0], [0], [1], [0, 0, 1, 1], [], []>} : vector<16x16xf32>, vector<16x32xf32>, vector<16x32xf32> -> vector<16x32xf32>
    %c0_3 = arith.constant 0 : index
    %c0_4 = arith.constant 0 : index
    %3 = vector.load %arg3[%c0_3, %c0_4] : memref<1x32xf32, #tpu.memory_space<vmem>>, vector<1x32xf32>
    %4 = vector.broadcast %3 : vector<1x32xf32> to vector<16x32xf32>
    %5 = arith.addf %2, %4 : vector<16x32xf32>
    %cst_5 = arith.constant 0.000000e+00 : f32
    %6 = vector.broadcast %cst_5 : f32 to vector<16x32xf32>
    %7 = arith.maximumf %5, %6 : vector<16x32xf32>
    %c0_6 = arith.constant 0 : index
    %c0_7 = arith.constant 0 : index
    %8 = vector.load %arg4[%c0_6, %c0_7] : memref<32x16xf32, #tpu.memory_space<vmem>>, vector<32x16xf32>
    %cst_8 = arith.constant dense<0.000000e+00> : vector<16x16xf32>
    %9 = tpu.matmul %7, %8, %cst_8 {dimension_numbers = #tpu.dot_dimension_numbers<[1], [0], [0], [1], [0, 0, 1, 1], [], []>} : vector<16x32xf32>, vector<32x16xf32>, vector<16x16xf32> -> vector<16x16xf32>
    %c0_9 = arith.constant 0 : index
    %c0_10 = arith.constant 0 : index
    %10 = vector.load %arg5[%c0_9, %c0_10] : memref<1x16xf32, #tpu.memory_space<vmem>>, vector<1x16xf32>
    %11 = vector.broadcast %10 : vector<1x16xf32> to vector<16x16xf32>
    %12 = arith.addf %9, %11 : vector<16x16xf32>
    %13 = vector.extract_strided_slice %12 {offsets = [0, 0], sizes = [16, 8], strides = [1, 1]} : vector<16x16xf32> to vector<16x8xf32>
    %c0_11 = arith.constant 0 : index
    %c0_12 = arith.constant 0 : index
    %14 = vector.load %arg11[%c0_11, %c0_12] : memref<16x8xf32, #tpu.memory_space<vmem>>, vector<16x8xf32>
    tpu.vector_store %arg11[%c0_11, %c0_12], %13 {strides = array<i32>} : memref<16x8xf32, #tpu.memory_space<vmem>>, vector<16x8xf32>,
    %15 = vector.extract_strided_slice %12 {offsets = [0, 8], sizes = [16, 8], strides = [1, 1]} : vector<16x16xf32> to vector<16x8xf32>
    %c0_13 = arith.constant 0 : index
    %c0_14 = arith.constant 0 : index
    %16 = vector.load %arg12[%c0_13, %c0_14] : memref<16x8xf32, #tpu.memory_space<vmem>>, vector<16x8xf32>
    tpu.vector_store %arg12[%c0_13, %c0_14], %15 {strides = array<i32>} : memref<16x8xf32, #tpu.memory_space<vmem>>, vector<16x8xf32>,
    %c0_15 = arith.constant 0 : index
    %c0_16 = arith.constant 0 : index
    %17 = vector.load %arg6[%c0_15, %c0_16] : memref<8x32xf32, #tpu.memory_space<vmem>>, vector<8x32xf32>
    %cst_17 = arith.constant dense<0.000000e+00> : vector<16x32xf32>
    %18 = tpu.matmul %13, %17, %cst_17 {dimension_numbers = #tpu.dot_dimension_numbers<[1], [0], [0], [1], [0, 0, 1, 1], [], []>} : vector<16x8xf32>, vector<8x32xf32>, vector<16x32xf32> -> vector<16x32xf32>
    %c0_18 = arith.constant 0 : index
    %c0_19 = arith.constant 0 : index
    %19 = vector.load %arg7[%c0_18, %c0_19] : memref<1x32xf32, #tpu.memory_space<vmem>>, vector<1x32xf32>
    %20 = vector.broadcast %19 : vector<1x32xf32> to vector<16x32xf32>
    %21 = arith.addf %18, %20 : vector<16x32xf32>
    %cst_20 = arith.constant 0.000000e+00 : f32
    %22 = vector.broadcast %cst_20 : f32 to vector<16x32xf32>
    %23 = arith.maximumf %21, %22 : vector<16x32xf32>
    %c0_21 = arith.constant 0 : index
    %c0_22 = arith.constant 0 : index
    %24 = vector.load %arg8[%c0_21, %c0_22] : memref<32x16xf32, #tpu.memory_space<vmem>>, vector<32x16xf32>
    %cst_23 = arith.constant dense<0.000000e+00> : vector<16x16xf32>
    %25 = tpu.matmul %23, %24, %cst_23 {dimension_numbers = #tpu.dot_dimension_numbers<[1], [0], [0], [1], [0, 0, 1, 1], [], []>} : vector<16x32xf32>, vector<32x16xf32>, vector<16x16xf32> -> vector<16x16xf32>
    %c0_24 = arith.constant 0 : index
    %c0_25 = arith.constant 0 : index
    %26 = vector.load %arg9[%c0_24, %c0_25] : memref<1x16xf32, #tpu.memory_space<vmem>>, vector<1x16xf32>
    %27 = vector.broadcast %26 : vector<1x16xf32> to vector<16x16xf32>
    %28 = arith.addf %25, %27 : vector<16x16xf32>
    %cst_26 = arith.constant 5.000000e-01 : f32
    %29 = vector.broadcast %cst_26 : f32 to vector<16x16xf32>
    %30 = arith.mulf %29, %28 : vector<16x16xf32>
    %31 = math.tanh %30 : vector<16x16xf32>
    %cst_27 = arith.constant 5.000000e-01 : f32
    %32 = vector.broadcast %cst_27 : f32 to vector<16x16xf32>
    %33 = arith.mulf %32, %31 : vector<16x16xf32>
    %cst_28 = arith.constant 5.000000e-01 : f32
    %34 = vector.broadcast %cst_28 : f32 to vector<16x16xf32>
    %35 = arith.addf %33, %34 : vector<16x16xf32>
    %c0_29 = arith.constant 0 : index
    %c0_30 = arith.constant 0 : index
    %36 = vector.load %arg10[%c0_29, %c0_30] : memref<16x16xf32, #tpu.memory_space<vmem>>, vector<16x16xf32>
    tpu.vector_store %arg10[%c0_29, %c0_30], %35 {strides = array<i32>} : memref<16x16xf32, #tpu.memory_space<vmem>>, vector<16x16xf32>,
    return
  }
  func.func @transform_0(%arg0: i32) -> (i32, i32) {
    %c0_i32 = arith.constant 0 : i32
    %c0_i32_0 = arith.constant 0 : i32
    return %arg0, %c0_i32 : i32, i32
  }
  func.func @transform_1(%arg0: i32) -> (i32, i32) {
    %c0_i32 = arith.constant 0 : i32
    %c0_i32_0 = arith.constant 0 : i32
    %c0_i32_1 = arith.constant 0 : i32
    return %c0_i32, %c0_i32_0 : i32, i32
  }
  func.func @transform_2(%arg0: i32) -> (i32, i32) {
    %c0_i32 = arith.constant 0 : i32
    %c0_i32_0 = arith.constant 0 : i32
    %c0_i32_1 = arith.constant 0 : i32
    return %c0_i32, %c0_i32_0 : i32, i32
  }
  func.func @transform_3(%arg0: i32) -> (i32, i32) {
    %c0_i32 = arith.constant 0 : i32
    %c0_i32_0 = arith.constant 0 : i32
    %c0_i32_1 = arith.constant 0 : i32
    return %c0_i32, %c0_i32_0 : i32, i32
  }
  func.func @transform_4(%arg0: i32) -> (i32, i32) {
    %c0_i32 = arith.constant 0 : i32
    %c0_i32_0 = arith.constant 0 : i32
    %c0_i32_1 = arith.constant 0 : i32
    return %c0_i32, %c0_i32_0 : i32, i32
  }
  func.func @transform_5(%arg0: i32) -> (i32, i32) {
    %c0_i32 = arith.constant 0 : i32
    %c0_i32_0 = arith.constant 0 : i32
    %c0_i32_1 = arith.constant 0 : i32
    return %c0_i32, %c0_i32_0 : i32, i32
  }
  func.func @transform_6(%arg0: i32) -> (i32, i32) {
    %c0_i32 = arith.constant 0 : i32
    %c0_i32_0 = arith.constant 0 : i32
    %c0_i32_1 = arith.constant 0 : i32
    return %c0_i32, %c0_i32_0 : i32, i32
  }
  func.func @transform_7(%arg0: i32) -> (i32, i32) {
    %c0_i32 = arith.constant 0 : i32
    %c0_i32_0 = arith.constant 0 : i32
    %c0_i32_1 = arith.constant 0 : i32
    return %c0_i32, %c0_i32_0 : i32, i32
  }
  func.func @transform_8(%arg0: i32) -> (i32, i32) {
    %c0_i32 = arith.constant 0 : i32
    %c0_i32_0 = arith.constant 0 : i32
    %c0_i32_1 = arith.constant 0 : i32
    return %c0_i32, %c0_i32_0 : i32, i32
  }
  func.func @transform_9(%arg0: i32) -> (i32, i32) {
    %c0_i32 = arith.constant 0 : i32
    %c0_i32_0 = arith.constant 0 : i32
    return %arg0, %c0_i32 : i32, i32
  }
  func.func @transform_10(%arg0: i32) -> (i32, i32) {
    %c0_i32 = arith.constant 0 : i32
    %c0_i32_0 = arith.constant 0 : i32
    return %arg0, %c0_i32 : i32, i32
  }
  func.func @transform_11(%arg0: i32) -> (i32, i32) {
    %c0_i32 = arith.constant 0 : i32
    %c0_i32_0 = arith.constant 0 : i32
    return %arg0, %c0_i32 : i32, i32
  }
}

</mosaic_0001>

<bundles_post_ra>
// kernel: tpu_custom_call.1
= control target key start
LH: loop header
LB: loop body
LE: loop exit
PB: predicated region body
PF: predicated region fallthrough
CT: control target
= control target key end

     0   :  { %vm47_vm0 = vcmask 130048   ;;  %s722_s0 = inlined_call_operand.vmem [shape: f32[16,16], index: 0, kind: input, shape index: {}]   ;;  %s723_s1 = inlined_call_operand.vmem [shape: f32[16,32], index: 1, kind: input, shape index: {}]   ;;  %s724_s2 = inlined_call_operand.vmem [shape: f32[1,32], index: 2, kind: input, shape index: {}]   ;;  %s725_s3 = inlined_call_operand.vmem [shape: f32[32,16], index: 3, kind: input, shape index: {}]   ;;  %s726_s4 = inlined_call_operand.vmem [shape: f32[1,16], index: 4, kind: input, shape index: {}]   ;;  %s727_s5 = inlined_call_operand.vmem [shape: f32[8,32], index: 5, kind: input, shape index: {}]   ;;  %s728_s6 = inlined_call_operand.vmem [shape: f32[1,32], index: 6, kind: input, shape index: {}]   ;;  %s729_s7 = inlined_call_operand.vmem [shape: f32[32,16], index: 7, kind: input, shape index: {}]   ;;  %s730_s8 = inlined_call_operand.vmem [shape: f32[1,16], index: 8, kind: input, shape index: {}]   ;;  %s731_s9 = inlined_call_operand.hbm [shape: f32[16,16], index: 9, kind: output, shape index: {0}]   ;;  %s732_s10 = inlined_call_operand.vmem [shape: f32[16,8], index: 10, kind: output, shape index: {1}]   ;;  %s733_s11 = inlined_call_operand.vmem [shape: f32[16,8], index: 11, kind: output, shape index: {2}]  }
   0x1   :  { %v38_v0 = vld [vmem:[%s723_s1] sm:$0xff]  ;;  %v39_v1 = vld [vmem:[%s723_s1 + $0x8] sm:$0xff] }
   0x2   :  { %v36_v2 = vld [vmem:[%s722_s0] sm:$0xff]  ;;  %v517_v3 = vpack.c.bf16 %v39_v1, %v38_v0  ;;  %v132_v5 = vld [vmem:[%s725_s3 + $0x8] sm:$0xff] }
   0x3   :  { %487 = vmatprep.mubr.msk.f32.mxu1 %vm47_vm0, %v36_v2  ;;  %v131_v4 = vld [vmem:[%s725_s3] sm:$0xff] }
   0x4   :  { %v521_v6 = vpack.c.bf16 %v132_v5, %v131_v4 }
   0x5   :  { %17 = vsyncpa [#allocation3], 0  ;;  %518 = vmatprep.subr.bf16.mxu1 %v517_v3  ;;  %v37_v7 = vld [vmem:[%s722_s0 + $0x8] sm:$0xff]  ;;  %v133_v8 = vld [vmem:[%s725_s3 + $0x10] sm:$0xff]  ;;  %vm142_vm1 = vcmask 261120   ;;  %vm224_vm2 = vcmask 64512  }
   0x6   :  { %520 = vmatpush3.bf16.msra.mxu1 %v517_v3  ;;  %v134_v9 = vld [vmem:[%s725_s3 + $0x18] sm:$0xff]  ;;  %v452_v11 = vld [vmem:[%s724_s2] ss:$0 sm:$0xff]  ;;  %v327_v20 = vld [vmem:[%s729_s7 + $0x8] sm:$0xff]  ;;  %s569_s23 = smov 120  }
   0x7   :  { %522 = vmatprep.subr.bf16.mxu1 %v521_v6  ;;  %v525_v10 = vpack.c.bf16 %v134_v9, %v133_v8  ;;  %v237_v18 = vld [vmem:[%s727_s5] sm:$0xff]  ;;  %v328_v27 = vld [vmem:[%s729_s7 + $0x10] sm:$0xff]  ;;  %v329_v28 = vld [vmem:[%s729_s7 + $0x18] sm:$0xff] }
   0x8   :  { %501 = vmatprep.subr.mxu0 %v237_v18  ;;  %v326_v19 = vld [vmem:[%s729_s7] sm:$0xff]  ;;  %v533_v29 = vpack.c.bf16 %v329_v28, %v328_v27 }
   0x9   :  { %488 = vmatmul.mubr.msk.f32.vlgmr.msra.gmra.mrb[0].mxu1 %vm47_vm0, %v37_v7  ;;  %502 = vmatpush3.msra.mxu0 %v237_v18  ;;  %v529_v21 = vpack.c.bf16 %v327_v20, %v326_v19  ;;  %v455_v22 = vld [vmem:[%s726_s4] ss:$0 sm:$0xff] }
   0xa   :  { %524 = vmatpush3.bf16.msra.mxu1 %v521_v6  ;;  %v458_v32 = vld [vmem:[%s728_s6] ss:$0 sm:$0xff]  ;;  %s570_s6 = smov [#allocation2]  }
   0xb   :  { %526 = vmatprep.subr.bf16.mxu1 %v525_v10  ;;  %530 = vmatprep.subr.bf16.mxu0 %v529_v21  ;;  %v461_v39 = vld [vmem:[%s730_s8] ss:$0 sm:$0xff] }
   0xe   :  { %528 = vmatpush3.bf16.msra.mxu1 %v525_v10 }
  0xdc   :  { %v489_v12 = vpop.f32.mrb[0].mxu1 }
  0xdd   :  { %v126_v13 = vadd.f32 %v489_v12, %v452_v11  ;;  %v120_v14 = vpop.f32.mrb[1].mxu1 }
  0xde   :  { %v121_v15 = vadd.f32 %v452_v11, %v120_v14 }
  0xdf   :  { %v130_v17 = vmax.f32 %v126_v13, 0.0 }
  0xe0   :  { %v129_v16 = vmax.f32 %v121_v15, 0.0 }
  0xe2   :  { %498 = vmatprep.mubr.msk.f32.mxu1 %vm142_vm1, %v129_v16 }
  0xe3   :  { %499 = vmatmul.mubr.msk.f32.vlgmr.msra.gmra.mrb[2].mxu1 %vm142_vm1, %v130_v17 }
 0x1b6   :  { %v500_v23 = vpop.f32.mrb[2].mxu1 }
 0x1b7   :  { %v221_v24 = vadd.f32 %v500_v23, %v455_v22  ;;  %v215_v25 = vpop.f32.mrb[3].mxu1 }
 0x1b8   :  { %v216_v26 = vadd.f32 %v455_v22, %v215_v25 }
 0x1b9   :  { %226 = vst.msk [vmem:[%s732_s10 + $0x8] sm:$0xff] %vm224_vm2, %v221_v24 }
 0x1ba   :  { %225 = vst.msk [vmem:[%s732_s10] sm:$0xff] %vm224_vm2, %v216_v26  ;;  %229 = vrot.lane.b32.xlu0 %v216_v26, %s569_s23  ;;  %503 = vmatprep.mubr.msk.f32.mxu0 %vm224_vm2, %v216_v26 }
 0x1bb   :  { %504 = vmatmul.mubr.msk.f32.vlgmr.msra.gmra.mrb[0].mxu0 %vm224_vm2, %v221_v24 }
 0x1bc   :  { %532 = vmatpush3.bf16.msra.mxu0 %v529_v21 }
 0x1bd   :  { %534 = vmatprep.subr.bf16.mxu0 %v533_v29 }
 0x1be   :  { %231 = vrot.lane.b32.xlu0 %v221_v24, %s569_s23 }
 0x1c0   :  { %536 = vmatpush3.bf16.msra.mxu0 %v533_v29 }
 0x22c   :  { %v230_v30 = vpop.permute.xlu0 %229 }
 0x22d   :  { %235 = vst.msk [vmem:[%s733_s11] sm:$0xff] %vm224_vm2, %v230_v30 }
 0x230   :  { %v232_v31 = vpop.permute.xlu0 %231 }
 0x231   :  { %236 = vst.msk [vmem:[%s733_s11 + $0x8] sm:$0xff] %vm224_vm2, %v232_v31  ;;  %s433_s11 = sshll.u32 %s570_s6, 4  ;;  %s434_s11 = int_to_ptr.vmem [resolvable:$true] %s433_s11 }
 0x232   :  { %s545_s8 = scalar_lea.vmem %s434_s11, 256  ;;  %p550_p1 = scmp.lt.s32.totalorder %s434_s11, %s434_s11 }
 0x233   :  { %p546_p0 = scmp.ne.s32.totalorder %s434_s11, %s545_s8  ;;  %p551_p2 = scmp.lt.s32.totalorder %s545_s8, %s545_s8 }
 0x235   :  { %p552_p3 = por %p551_p2, %p550_p1 }
 0x237   :  { %p553_p4 = pnand %p552_p3, %p546_p0 }
 0x28e   :  { %v505_v33 = vpop.f32.mrb[0].mxu0 }
 0x28f   :  { %v321_v34 = vadd.f32 %v505_v33, %v458_v32  ;;  %v315_v35 = vpop.f32.mrb[1].mxu0 }
 0x290   :  { %v316_v36 = vadd.f32 %v458_v32, %v315_v35 }
 0x291   :  { %v325_v38 = vmax.f32 %v321_v34, 0.0 }
 0x292   :  { %v324_v37 = vmax.f32 %v316_v36, 0.0 }
 0x294   :  { %514 = vmatprep.mubr.msk.f32.mxu0 %vm142_vm1, %v324_v37 }
 0x295   :  { %515 = vmatmul.mubr.msk.f32.vlgmr.msra.gmra.mrb[2].mxu0 %vm142_vm1, %v325_v38 }
 0x368   :  { %v516_v40 = vpop.f32.mrb[2].mxu0 }
 0x369   :  { %v415_v41 = vadd.f32 %v516_v40, %v461_v39  ;;  %v409_v42 = vpop.f32.mrb[3].mxu0 }
 0x36a   :  { %v410_v43 = vadd.f32 %v461_v39, %v409_v42 }
 0x36b   :  { %v419_v44 = vmul.f32 0.5, %v415_v41 }
 0x36c   :  { %v418_v45 = vmul.f32 0.5, %v410_v43 }
 0x36d   :  { %541 = vtanh.f32 %v419_v44 }
 0x36e   :  { %543 = vtanh.f32 %v418_v45 }
 0x377   :  { %v542_v46 = vpop.eup %541 }
 0x378   :  { %v544_v47 = vpop.eup %543  ;;  %v423_v48 = vmul.f32 0.5, %v542_v46 }
 0x379   :  { %v422_v49 = vmul.f32 0.5, %v544_v47 }
 0x37a   :  { %v425_v50 = vadd.f32 0.5, %v423_v48 }
 0x37b   :  { %v424_v51 = vadd.f32 0.5, %v422_v49 }
 0x37c   :  { %427 = vst.msk [vmem:[#allocation2 + $0x8] sm:$0xff] %vm47_vm0, %v425_v50 }
 0x37d   :  { %426 = vst.msk [vmem:[#allocation2] sm:$0xff] %vm47_vm0, %v424_v51 }
 0x37e   :  { %556 = shalt.err (!%p553_p4)
}
 0x37f   :  { %s557_s0 = scalar_lea.hbm %s731_s9, 256 }
 0x380   :  { %p558_p5 = scmp.ne.s32.totalorder %s731_s9, %s557_s0  ;;  %p561_p6 = scmp.lt.u32.totalorder %s557_s0, %s731_s9 }
 0x382   :  { %p563_p7 = pnand %p561_p6, %p558_p5 }
 0x384   :  { %566 = shalt.err (!%p563_p7)
}
 0x385   :  { %s571_s17 = smov 128   ;;  %s572_s18 = smov 8  }
 0x386   :  { %439 = dma.vmem_to_hbm [thread:$0]  %s434_s11, 256, %s731_s9, [#allocation3], %s571_s17, %s571_s17, %s572_s18  }
 0x387   :  { %567 = dma.done.wait [#allocation3], 256  }
 0x388   :  { %568 = vsyncadd [#allocation3], 4294967040 }
 0x389   :  { %451 = vsyncpa [#allocation3], 1 }

</bundles_post_ra>
